<compile_context>
chip_gen: v6e
topology: v6e:2x2x1
jax: 0.10.0
libtpu: 0.0.40
codegen_flags: <defaults>
</compile_context>

<pallas_src>
import math
import functools

import jax
import jax.numpy as jnp
from jax.experimental import pallas as pl
from jax.experimental.pallas import tpu as pltpu


# ---------------------------------------------------------------------------
# PE table construction (matches the PyTorch __init__ exactly, incl. log(100.0))
# ---------------------------------------------------------------------------
def make_pe_table(d_model: int, max_len: int) -> jnp.ndarray:
    assert d_model % 2 == 0, "PositionalEncoding requires even d_model (as in the PyTorch source)"
    position = jnp.arange(0, max_len, dtype=jnp.float32)[:, None]           # (max_len, 1)
    div_term = jnp.exp(
        jnp.arange(0, d_model, 2, dtype=jnp.float32) * (-(math.log(100.0) / d_model))
    )                                                                        # (d_model//2,)
    angles = position * div_term                                             # (max_len, d_model//2)
    sin = jnp.sin(angles)
    cos = jnp.cos(angles)
    # interleave: pe[:, 0::2] = sin, pe[:, 1::2] = cos
    pe = jnp.stack([sin, cos], axis=-1).reshape(max_len, d_model)            # (max_len, d_model)
    return pe


# ---------------------------------------------------------------------------
# Tiling helper: lane-dense ~2 MiB blocks
# ---------------------------------------------------------------------------
TARGET_BLOCK_BYTES = 2 * 1024 * 1024  # ~2 MiB/step: >85% HBM roofline, fits default scoped VMEM


def _largest_divisor_leq(n: int, cap: int, step: int) -> int:
    """Largest d with d % step == 0, d | n, d <= cap (requires step | n, step <= cap)."""
    best = step
    d = step
    limit = min(n, cap)
    while d <= limit:
        if n % d == 0:
            best = d
        d += step
    return best


def _pick_tiles(nrows: int, ncols: int, itemsize: int):
    # Column (lane) tile: multiple of 128 => unmasked, lane-dense stores.
    if ncols % 128 == 0:
        cap_c = max(128, TARGET_BLOCK_BYTES // (8 * itemsize))
        tc = _largest_divisor_leq(ncols, cap_c, 128)
    else:
        tc = ncols  # full-dim block is the only legal non-multiple-of-128 choice
    # Row (sublane) tile: multiple of 8, sized so tr*tc*itemsize ~= TARGET_BLOCK_BYTES.
    cap_r = max(8, TARGET_BLOCK_BYTES // (tc * itemsize))
    if nrows % 8 == 0:
        tr = _largest_divisor_leq(nrows, max(8, min(nrows, cap_r)), 8)
    else:
        tr = nrows  # full-dim fallback (e.g. tiny demo batches)
    return tr, tc


# ---------------------------------------------------------------------------
# Pallas kernels
# ---------------------------------------------------------------------------
def _pe_add_kernel(x_ref, pe_ref, o_ref):
    # x_ref: (TR, TC), pe_ref: (1, TC) -> sublane-broadcast add
    o_ref[...] = (x_ref[...] + pe_ref[...]).astype(o_ref.dtype)


def _pe_add_dropout_kernel(x_ref, pe_ref, bits_ref, o_ref, *, threshold: int, inv_keep: float):
    # keep ~ Bernoulli(1-p): raw uint32 bits vs precomputed uint32 threshold
    # (no int->float convert; no arithmetic-shift sign bug).
    y = x_ref[...] + pe_ref[...]
    keep = bits_ref[...] >= jnp.uint32(threshold)
    scale = jnp.where(keep, inv_keep, 0.0).astype(y.dtype)
    o_ref[...] = (y * scale).astype(o_ref.dtype)


# ---------------------------------------------------------------------------
# Wrapper
# ---------------------------------------------------------------------------
def positional_encoding_forward(x, pe_table, *, p: float = 0.1,
                                training: bool = False, rng_key=None):
    """x: (B, L, D). Returns x + pe[:L] (with inverted-dropout if training)."""
    B, L, D = x.shape
    pe_slice = pe_table[:L, :].astype(x.dtype)                # (L, D)

    # Flatten so the last (lane) dim is L*D -> lane-dense when L*D % 128 == 0.
    ncols = L * D
    x2 = x.reshape(B, ncols)
    pe2 = pe_slice.reshape(1, ncols)

    itemsize = jnp.dtype(x.dtype).itemsize
    tr, tc = _pick_tiles(B, ncols, itemsize)
    # Grid: columns outer, rows (batch) INNER, so the PE block index (0, c) is
    # constant across the inner loop and the PE tile stays resident in VMEM.
    grid = (ncols // tc, B // tr)

    x_spec = pl.BlockSpec((tr, tc), lambda c, r: (r, c))
    pe_spec = pl.BlockSpec((1, tc), lambda c, r: (0, c))
    out_spec = pl.BlockSpec((tr, tc), lambda c, r: (r, c))
    cparams = pltpu.CompilerParams(dimension_semantics=("parallel", "parallel"))
    out_shape = jax.ShapeDtypeStruct((B, ncols), x.dtype)

    if (not training) or p <= 0.0:
        out2 = pl.pallas_call(
            _pe_add_kernel,
            out_shape=out_shape,
            grid_spec=pltpu.PrefetchScalarGridSpec(
                num_scalar_prefetch=0,
                grid=grid,
                in_specs=[x_spec, pe_spec],
                out_specs=out_spec),
            compiler_params=cparams,
        )(x2, pe2)
        return out2.reshape(B, L, D)

    # Training-mode dropout. Random bits come from jax.random (outside the
    # kernel); the threshold compare + scale happens in-kernel.
    # (Exact torch RNG bit-parity is not reproducible; semantics match.)
    if rng_key is None:
        rng_key = jax.random.PRNGKey(0)
    bits = jax.random.bits(rng_key, (B, ncols), dtype=jnp.uint32)
    threshold = min(int(round(p * (2 ** 32))), 2 ** 32 - 1)
    inv_keep = 1.0 / (1.0 - p)

    bits_spec = pl.BlockSpec((tr, tc), lambda c, r: (r, c))
    out2 = pl.pallas_call(
        functools.partial(_pe_add_dropout_kernel, threshold=threshold, inv_keep=inv_keep),
        out_shape=out_shape,
        grid_spec=pltpu.PrefetchScalarGridSpec(
            num_scalar_prefetch=0,
            grid=grid,
            in_specs=[x_spec, pe_spec, bits_spec],
            out_specs=out_spec),
        compiler_params=cparams,
    )(x2, pe2, bits)
    return out2.reshape(B, L, D)


# ---------------------------------------------------------------------------
# Main
# ---------------------------------------------------------------------------
if __name__ == "__main__":
    B, L, D = 2, 8, 32          # batch, seq, d_model
    MAX_LEN = 64                # small stand-in for max_len=5000
    DROPOUT_P = 0.1

    key = jax.random.PRNGKey(0)
    k_x, k_drop = jax.random.split(key)
    x = jax.random.normal(k_x, (B, L, D), dtype=jnp.float32)

    pe_table = make_pe_table(D, MAX_LEN)

    # Inference / eval forward (dropout is identity) -- matches PyTorch .eval()
    out = positional_encoding_forward(x, pe_table, p=DROPOUT_P, training=False)
    out = jax.block_until_ready(out)

    ref = x + pe_table[None, :L, :]
    assert jnp.allclose(out, ref, atol=1e-6), "eval-path mismatch vs reference"

    # Training-mode forward (in-kernel inverted dropout).
    out_train = positional_encoding_forward(
        x, pe_table, p=DROPOUT_P, training=True, rng_key=k_drop)
    out_train = jax.block_until_ready(out_train)

    # Each element must be either dropped (0) or (x+pe)/(1-p).
    scaled = ref / (1.0 - DROPOUT_P)
    ok = jnp.isclose(out_train, 0.0, atol=1e-6) | jnp.isclose(out_train, scaled,
                                                              rtol=1e-5, atol=1e-6)
    assert bool(jnp.all(ok)), "training-path dropout output malformed"

    print("KERNEL_OK")
</pallas_src>

<mosaic_0001>
module attributes {stable_mosaic.version = 11 : i64} {
  func.func @_pe_add_kernel(%arg0: i32, %arg1: i32, %arg2: memref<2x256xf32, #tpu.memory_space<vmem>>, %arg3: memref<1x256xf32, #tpu.memory_space<vmem>>, %arg4: memref<2x256xf32, #tpu.memory_space<vmem>>) attributes {dimension_semantics = [#tpu.dimension_semantics<parallel>, #tpu.dimension_semantics<parallel>], iteration_bounds = array<i64: 1, 1>, scalar_prefetch = 0 : i64, scratch_operands = 0 : i64, tpu.core_type = #tpu.core_type<tc>, window_params = [{transform_indices = @transform_0, window_bounds = array<i64: 2, 256>}, {transform_indices = @transform_1, window_bounds = array<i64: 1, 256>}, {transform_indices = @transform_2, window_bounds = array<i64: 2, 256>}]} {
    %c0 = arith.constant 0 : index
    %c0_0 = arith.constant 0 : index
    %0 = vector.load %arg2[%c0, %c0_0] : memref<2x256xf32, #tpu.memory_space<vmem>>, vector<2x256xf32>
    %c0_1 = arith.constant 0 : index
    %c0_2 = arith.constant 0 : index
    %1 = vector.load %arg3[%c0_1, %c0_2] : memref<1x256xf32, #tpu.memory_space<vmem>>, vector<1x256xf32>
    %2 = vector.broadcast %1 : vector<1x256xf32> to vector<2x256xf32>
    %3 = arith.addf %0, %2 : vector<2x256xf32>
    %c0_3 = arith.constant 0 : index
    %c0_4 = arith.constant 0 : index
    %4 = vector.load %arg4[%c0_3, %c0_4] : memref<2x256xf32, #tpu.memory_space<vmem>>, vector<2x256xf32>
    tpu.vector_store %arg4[%c0_3, %c0_4], %3 {strides = array<i32>} : memref<2x256xf32, #tpu.memory_space<vmem>>, vector<2x256xf32>,
    return
  }
  func.func @transform_0(%arg0: i32, %arg1: i32) -> (i32, i32) {
    %c0_i32 = arith.constant 0 : i32
    return %arg1, %arg0 : i32, i32
  }
  func.func @transform_1(%arg0: i32, %arg1: i32) -> (i32, i32) {
    %c0_i32 = arith.constant 0 : i32
    %c0_i32_0 = arith.constant 0 : i32
    return %c0_i32, %arg0 : i32, i32
  }
  func.func @transform_2(%arg0: i32, %arg1: i32) -> (i32, i32) {
    %c0_i32 = arith.constant 0 : i32
    return %arg1, %arg0 : i32, i32
  }
}

</mosaic_0001>

<bundles_post_ra>
// kernel: tpu_custom_call.1
= control target key start
LH: loop header
LB: loop body
LE: loop exit
PB: predicated region body
PF: predicated region fallthrough
CT: control target
= control target key end

     0   :  { %7 = vsyncpa [#allocation3], 0  ;;  %s172_s0 = inlined_call_operand.hbm [shape: f32[2,256], index: 0, kind: input, shape index: {}]   ;;  %s173_s1 = inlined_call_operand.hbm [shape: f32[1,256], index: 1, kind: input, shape index: {}]   ;;  %s174_s2 = inlined_call_operand.hbm [shape: f32[2,256], index: 2, kind: output, shape index: {}]  }
   0x1   :  { %8 = vsyncpa [#allocation6], 0 }
   0x2   :  { %9 = vsyncpa [#allocation4], 0  ;;  %s144_s9 = smov [#allocation2]   ;;  %s145_s11 = smov [#allocation5]  }
   0x3   :  { %s16_s10 = sshll.u32 %s144_s9, 4  ;;  %s26_s12 = sshll.u32 %s145_s11, 4  ;;  %s17_s10 = int_to_ptr.vmem [resolvable:$true] %s16_s10  ;;  %s27_s12 = int_to_ptr.vmem [resolvable:$true] %s26_s12 }
   0x4   :  { %s86_s13 = scalar_lea.vmem %s17_s10, 64  ;;  %p91_p1 = scmp.lt.s32.totalorder %s17_s10, %s17_s10 }
   0x5   :  { %p87_p0 = scmp.ne.s32.totalorder %s17_s10, %s86_s13  ;;  %p92_p2 = scmp.lt.s32.totalorder %s86_s13, %s86_s13 }
   0x7   :  { %p93_p3 = por %p92_p2, %p91_p1 }
   0x9   :  { %p94_p4 = pnand %p93_p3, %p87_p0 }
   0xb   :  { %97 = shalt.err (!%p94_p4)
}
   0xc   :  { %19 = dma.hbm_to_vmem [thread:$0]  %s172_s0, 64, %s17_s10, [#allocation3]  }
   0xd   :  { %s106_s16 = scalar_lea.vmem %s27_s12, 32  ;;  %p111_p6 = scmp.lt.s32.totalorder %s27_s12, %s27_s12 }
   0xe   :  { %p107_p5 = scmp.ne.s32.totalorder %s27_s12, %s106_s16  ;;  %p112_p7 = scmp.lt.s32.totalorder %s106_s16, %s106_s16 }
  0x10   :  { %p113_p8 = por %p112_p7, %p111_p6 }
  0x12   :  { %p114_p9 = pnand %p113_p8, %p107_p5 }
  0x14   :  { %117 = shalt.err (!%p114_p9)
}
  0x15   :  { %29 = dma.hbm_to_vmem [thread:$0]  %s173_s1, 32, %s27_s12, [#allocation6]  }
  0x16   :  { %138 = dma.done.wait [#allocation3], 64  }
  0x17   :  { %139 = vsyncadd [#allocation3], 4294967232 }
  0x18   :  { %140 = dma.done.wait [#allocation6], 32  }
  0x19   :  { %141 = vsyncadd [#allocation6], 4294967264  ;;  %v39_v0 = vlaneseq  ;;  %v146_v1 = vmov 1983009808   ;;  %v37_v7 = vld [vmem:[#allocation5] sm:$0x3] }
  0x1a   :  { %v49_v2 = vunpack.c.l.s4 %v146_v1  ;;  %v36_v12 = vld [vmem:[#allocation2] sm:$0xf]  ;;  %s147_s0 = smov [#allocation7]  }
  0x1b   :  { %v40_v3 = vshrl.u32 %v39_v0, 7  ;;  %s64_s19 = sshll.u32 %s147_s0, 4  ;;  %s65_s19 = int_to_ptr.vmem [resolvable:$true] %s64_s19 }
  0x1c   :  { %v50_v6 = vunpack.c.0.s8 %v49_v2  ;;  %s118_s1 = scalar_lea.vmem %s65_s19, 64  ;;  %p123_p11 = scmp.lt.s32.totalorder %s65_s19, %s65_s19 }
  0x1d   :  { %v41_v4 = vsub.s32 0, %v40_v3  ;;  %v45_v5 = vsub.s32 1, %v40_v3  ;;  %p119_p10 = scmp.ne.s32.totalorder %s65_s19, %s118_s1  ;;  %p124_p12 = scmp.lt.s32.totalorder %s118_s1, %s118_s1 }
  0x1e   :  { %v53_v10 = vsub.s32 %v50_v6, %v40_v3 }
  0x1f   :  { %v42_v8 = vrot.slane %v37_v7, %v41_v4  ;;  %v46_v9 = vrot.slane %v37_v7, %v45_v5  ;;  %p125_p13 = por %p124_p12, %p123_p11 }
  0x21   :  { %v47_v11 = vcombine.low %v42_v8, %v46_v9  ;;  %p126_p0 = pnand %p125_p13, %p119_p10 }
  0x23   :  { %v54_v13 = vrot.slane %v47_v11, %v53_v10 }
  0x25   :  { %v56_v14 = vadd.f32 %v54_v13, %v36_v12 }
  0x27   :  { %57 = vst [vmem:[#allocation7] sm:$0xf] %v56_v14 }
  0x28   :  { %129 = shalt.err (!%p126_p0)
}
  0x29   :  { %67 = dma.vmem_to_hbm [thread:$0]  %s65_s19, 64, %s174_s2, [#allocation4]  }
  0x2a   :  { %142 = dma.done.wait [#allocation4], 64  }
  0x2b   :  { %143 = vsyncadd [#allocation4], 4294967232 }
  0x2c   :  { %71 = vsyncpa [#allocation3], 1 }
  0x2d   :  { %72 = vsyncpa [#allocation6], 1 }
  0x2e   :  { %73 = vsyncpa [#allocation4], 1 }

</bundles_post_ra>
